<compile_context>
chip_gen: v7x
topology: tpu7x:2x2x1
jax: 0.10.0
libtpu: 0.0.40
codegen_flags: <defaults>
</compile_context>

<pallas_src>
import functools

import jax
import jax.numpy as jnp
from jax.experimental import pallas as pl
from jax.experimental.pallas import tpu as pltpu


# ----------------------------- Pallas kernel -----------------------------

def _attention_kernel(x_ref, wblk_ref, qblk_ref, o_ref, *, split, num_heads, per_dim):
    # x_ref   : (T, S*D)      row tile, splits contiguous along lanes
    # wblk_ref: (S*D, S*H*P)  block-diagonal projection weights (all splits, all heads)
    # qblk_ref: (S*H*P, S*H)  block-diagonal per-(split, head) attention vectors
    # o_ref   : (T, H*P)      output in torch.cat(dim=1) head order
    S, H, P = split, num_heads, per_dim
    HP = H * P
    SH = S * H
    SHP = S * HP

    x = x_ref[...]                                                           # (T, S*D)
    # One fused projection for all splits & heads.
    xp = jnp.dot(x, wblk_ref[...], preferred_element_type=jnp.float32)       # (T, S*HP)
    # All per-(split, head) attention logits in one matmul.
    scores = jnp.dot(xp, qblk_ref[...], preferred_element_type=jnp.float32)  # (T, S*H)
    scores = jnp.where(scores > 0, scores, 0.2 * scores)                     # LeakyReLU(0.2)

    # Softmax over the split dim (torch dim=1) per head; score columns are s*H + h.
    # These slices touch only a 12-lane array -> negligible next to the 96-lane work.
    chunks = [scores[:, s * H:(s + 1) * H] for s in range(S)]                # (T, H) each
    m = chunks[0]
    for c in chunks[1:]:
        m = jnp.maximum(m, c)
    exps = [jnp.exp(c - m) for c in chunks]
    denom = exps[0]
    for e in exps[1:]:
        denom = denom + e
    inv = pl.reciprocal(denom, approx=True)                                  # EUP vrcp seed
    inv = inv * (2.0 - denom * inv)                                          # 1 Newton step ~ exact f32

    # Expand each per-(split, head) attention scalar to its P-wide block of (T, S*HP).
    rows = jax.lax.broadcasted_iota(jnp.int32, (H, SHP), 0)
    cols = jax.lax.broadcasted_iota(jnp.int32, (H, SHP), 1)
    att_b = jnp.zeros(xp.shape, jnp.float32)
    for s in range(S):
        lo = rows * P + s * HP
        expand_s = jnp.where((cols >= lo) & (cols < lo + P), 1.0, 0.0)       # (H, S*HP)
        att_b = att_b + jnp.dot(exps[s] * inv, expand_s,
                                preferred_element_type=jnp.float32)

    # (x_ * att).sum(dim=split) for every head at once: one matmul against the
    # stacked-identity matrix (S*HP, HP); output already in torch.cat head order.
    r2 = jax.lax.broadcasted_iota(jnp.int32, (SHP, HP), 0)
    c2 = jax.lax.broadcasted_iota(jnp.int32, (SHP, HP), 1)
    sum_mat = jnp.zeros((SHP, HP), jnp.float32)
    for s in range(S):
        sum_mat = sum_mat + jnp.where(r2 == c2 + s * HP, 1.0, 0.0)
    out = jnp.dot(xp * att_b, sum_mat, preferred_element_type=jnp.float32)   # (T, HP)
    o_ref[...] = out.astype(o_ref.dtype)


# ----------------------------- wrapper -----------------------------

def attention_module(x, W_heads, q_heads, *, split, tile_n=512):
    """AttentionModule.forward: x (N, split*D) -> (N, H*P)."""
    H, D, P = W_heads.shape
    N = x.shape[0]
    HP = H * P
    SD = split * D
    SH = split * H
    SHP = split * HP
    assert x.shape[1] == SD

    f32 = jnp.float32
    # Per-head weights packed head-major along the output dim (torch.cat order),
    # then block-diagonal over splits so the kernel does one lane-dense matmul.
    w_all = jnp.transpose(W_heads, (1, 0, 2)).reshape(D, HP).astype(f32)      # (D, H*P)
    w_blk = jnp.kron(jnp.eye(split, dtype=f32), w_all)                        # (S*D, S*H*P)
    # Per-head attention vectors: block-diagonal over heads, then over splits.
    qh = (q_heads[:, :, 0].astype(f32)[:, :, None]
          * jnp.eye(H, dtype=f32)[:, None, :]).reshape(HP, H)                 # (H*P, H)
    q_blk = jnp.kron(jnp.eye(split, dtype=f32), qh)                           # (S*H*P, S*H)

    # Row tiling: multiple of 8 sublanes, capped for tiny N, padded to a full grid.
    tile_n = max(8, min(tile_n, ((N + 7) // 8) * 8))
    n_pad = pl.cdiv(N, tile_n) * tile_n
    x_p = x.astype(f32)
    if n_pad != N:
        x_p = jnp.pad(x_p, ((0, n_pad - N), (0, 0)))

    flops = 2 * n_pad * (SD * SHP + SHP * SH + SH * SHP + SHP * HP)
    transcendentals = n_pad * (SH + H)
    bytes_accessed = 4 * (n_pad * SD + n_pad * HP + w_blk.size + q_blk.size)

    kernel = functools.partial(_attention_kernel, split=split, num_heads=H, per_dim=P)
    out = pl.pallas_call(
        kernel,
        out_shape=jax.ShapeDtypeStruct((n_pad, HP), f32),
        grid_spec=pltpu.PrefetchScalarGridSpec(
            num_scalar_prefetch=0,
            grid=(n_pad // tile_n,),
            in_specs=[
                pl.BlockSpec((tile_n, SD), lambda i: (i, 0)),   # streamed row tiles
                pl.BlockSpec((SD, SHP), lambda i: (0, 0)),      # resident weights
                pl.BlockSpec((SHP, SH), lambda i: (0, 0)),      # resident q
            ],
            out_specs=pl.BlockSpec((tile_n, HP), lambda i: (i, 0)),
        ),
        compiler_params=pltpu.CompilerParams(
            dimension_semantics=("parallel",),                  # v7x: both TCs
            vmem_limit_bytes=32 * 1024 * 1024,
        ),
        cost_estimate=pl.CostEstimate(flops=flops,
                                      transcendentals=transcendentals,
                                      bytes_accessed=bytes_accessed),
    )(x_p, w_blk, q_blk)
    return out[:N] if n_pad != N else out


# -------------------- reference (pure JAX, mirrors the torch code) --------------------

def attention_reference(x, W_heads, q_heads, *, split):
    H, D, P = W_heads.shape
    N = x.shape[0]
    x3 = x.reshape(N, split, D)                          # torch Tensor.resize (contiguous reshape)
    outs = []
    for h in range(H):
        x_ = jnp.einsum('nsd,dp->nsp', x3, W_heads[h])               # (N, S, P)
        att = jnp.einsum('nsp,pk->nsk', x_, q_heads[h])              # (N, S, 1)
        att = jnp.where(att > 0, att, 0.2 * att)                     # LeakyReLU(0.2)
        att = jax.nn.softmax(att, axis=1)
        outs.append(jnp.sum(x_ * att, axis=1))                       # (N, P)
    return jnp.concatenate(outs, axis=1)                             # (N, H*P)


def glorot(key, shape, gain=1.0):
    fan_in, fan_out = shape[-2], shape[-1]
    limit = gain * (6.0 / (fan_in + fan_out)) ** 0.5
    return jax.random.uniform(key, shape, jnp.float32, -limit, limit)


# ----------------------------- main -----------------------------

if __name__ == "__main__":
    key = jax.random.PRNGKey(0)

    # small shapes consistent with the module: input_dim=32, num_heads=4, split=3,
    # out_dim=32 (per_dim=8), 16 nodes -> x is (16, 96)
    input_dim, num_heads, split, out_dim = 32, 4, 3, 32
    per_dim = out_dim // num_heads
    n = 16

    key, kx, kw, kq = jax.random.split(key, 4)
    x = jax.random.normal(kx, (n, split * input_dim), jnp.float32)
    W_heads = glorot(kw, (num_heads, input_dim, per_dim))             # Linear(bias=False, glorot) per head
    q_heads = glorot(kq, (num_heads, per_dim, 1), gain=1.414)         # xavier_uniform_(gain=1.414)

    out = attention_module(x, W_heads, q_heads, split=split)
    out = jax.block_until_ready(out)
    assert out.shape == (n, num_heads * per_dim)

    ref = attention_reference(x, W_heads, q_heads, split=split)
    err = float(jnp.max(jnp.abs(out - ref)))
    # approx reciprocal + Newton refinement + MXU f32 -> slightly looser than 1e-5
    assert jnp.allclose(out, ref, atol=1e-4, rtol=1e-4), err

    # second small check that exercises the multi-tile grid + row padding path
    key, kx2 = jax.random.split(key)
    n2 = 520
    x2 = jax.random.normal(kx2, (n2, split * input_dim), jnp.float32)
    out2 = jax.block_until_ready(attention_module(x2, W_heads, q_heads, split=split))
    ref2 = attention_reference(x2, W_heads, q_heads, split=split)
    err2 = float(jnp.max(jnp.abs(out2 - ref2)))
    assert out2.shape == (n2, num_heads * per_dim)
    assert jnp.allclose(out2, ref2, atol=1e-4, rtol=1e-4), err2

    print("KERNEL_OK")
</pallas_src>

<mosaic_0001>
module attributes {stable_mosaic.version = 11 : i64} {
  func.func @_attention_kernel(%arg0: i32, %arg1: memref<16x96xf32, #tpu.memory_space<vmem>>, %arg2: memref<96x96xf32, #tpu.memory_space<vmem>>, %arg3: memref<96x12xf32, #tpu.memory_space<vmem>>, %arg4: memref<16x32xf32, #tpu.memory_space<vmem>>) attributes {dimension_semantics = [#tpu.dimension_semantics<parallel>], iteration_bounds = array<i64: 1>, scalar_prefetch = 0 : i64, scratch_operands = 0 : i64, tpu.core_type = #tpu.core_type<tc>, window_params = [{transform_indices = @transform_0, window_bounds = array<i64: 16, 96>}, {pipeline_mode = #tpu.pipeline_mode<synchronous>, transform_indices = @transform_1, window_bounds = array<i64: 96, 96>}, {pipeline_mode = #tpu.pipeline_mode<synchronous>, transform_indices = @transform_2, window_bounds = array<i64: 96, 12>}, {transform_indices = @transform_3, window_bounds = array<i64: 16, 32>}]} {
    %c0 = arith.constant 0 : index
    %c0_0 = arith.constant 0 : index
    %0 = vector.load %arg1[%c0, %c0_0] : memref<16x96xf32, #tpu.memory_space<vmem>>, vector<16x96xf32>
    %c0_1 = arith.constant 0 : index
    %c0_2 = arith.constant 0 : index
    %1 = vector.load %arg2[%c0_1, %c0_2] : memref<96x96xf32, #tpu.memory_space<vmem>>, vector<96x96xf32>
    %cst = arith.constant dense<0.000000e+00> : vector<16x96xf32>
    %2 = tpu.matmul %0, %1, %cst {dimension_numbers = #tpu.dot_dimension_numbers<[1], [0], [0], [1], [0, 0, 1, 1], [], []>} : vector<16x96xf32>, vector<96x96xf32>, vector<16x96xf32> -> vector<16x96xf32>
    %c0_3 = arith.constant 0 : index
    %c0_4 = arith.constant 0 : index
    %3 = vector.load %arg3[%c0_3, %c0_4] : memref<96x12xf32, #tpu.memory_space<vmem>>, vector<96x12xf32>
    %cst_5 = arith.constant dense<0.000000e+00> : vector<16x12xf32>
    %4 = tpu.matmul %2, %3, %cst_5 {dimension_numbers = #tpu.dot_dimension_numbers<[1], [0], [0], [1], [0, 0, 1, 1], [], []>} : vector<16x96xf32>, vector<96x12xf32>, vector<16x12xf32> -> vector<16x12xf32>
    %cst_6 = arith.constant 0.000000e+00 : f32
    %5 = vector.broadcast %cst_6 : f32 to vector<16x12xf32>
    %6 = arith.cmpf ogt, %4, %5 : vector<16x12xf32>
    %cst_7 = arith.constant 2.000000e-01 : f32
    %7 = vector.broadcast %cst_7 : f32 to vector<16x12xf32>
    %8 = arith.mulf %7, %4 : vector<16x12xf32>
    %9 = arith.select %6, %4, %8 : vector<16x12xi1>, vector<16x12xf32>
    %10 = vector.extract_strided_slice %9 {offsets = [0, 0], sizes = [16, 4], strides = [1, 1]} : vector<16x12xf32> to vector<16x4xf32>
    %11 = vector.extract_strided_slice %9 {offsets = [0, 4], sizes = [16, 4], strides = [1, 1]} : vector<16x12xf32> to vector<16x4xf32>
    %12 = vector.extract_strided_slice %9 {offsets = [0, 8], sizes = [16, 4], strides = [1, 1]} : vector<16x12xf32> to vector<16x4xf32>
    %13 = arith.maximumf %10, %11 : vector<16x4xf32>
    %14 = arith.maximumf %13, %12 : vector<16x4xf32>
    %15 = arith.subf %10, %14 : vector<16x4xf32>
    %16 = math.exp %15 : vector<16x4xf32>
    %17 = arith.subf %11, %14 : vector<16x4xf32>
    %18 = math.exp %17 : vector<16x4xf32>
    %19 = arith.subf %12, %14 : vector<16x4xf32>
    %20 = math.exp %19 : vector<16x4xf32>
    %21 = arith.addf %16, %18 : vector<16x4xf32>
    %22 = arith.addf %21, %20 : vector<16x4xf32>
    %23 = tpu.reciprocal %22 {approx = true} : vector<16x4xf32> -> vector<16x4xf32>
    %24 = arith.mulf %22, %23 : vector<16x4xf32>
    %cst_8 = arith.constant 2.000000e+00 : f32
    %25 = vector.broadcast %cst_8 : f32 to vector<16x4xf32>
    %26 = arith.subf %25, %24 : vector<16x4xf32>
    %27 = arith.mulf %23, %26 : vector<16x4xf32>
    %28 = tpu.iota {dimensions = array<i32: 0>} : vector<4x96xi32>
    %29 = tpu.iota {dimensions = array<i32: 1>} : vector<4x96xi32>
    %cst_9 = arith.constant 0.000000e+00 : f32
    %30 = vector.broadcast %cst_9 : f32 to vector<16x96xf32>
    %c8_i32 = arith.constant 8 : i32
    %31 = vector.broadcast %c8_i32 : i32 to vector<4x96xi32>
    %32 = arith.muli %28, %31 : vector<4x96xi32>
    %c0_i32 = arith.constant 0 : i32
    %33 = vector.broadcast %c0_i32 : i32 to vector<4x96xi32>
    %34 = arith.addi %32, %33 : vector<4x96xi32>
    %35 = arith.cmpi sge, %29, %34 : vector<4x96xi32>
    %c8_i32_10 = arith.constant 8 : i32
    %36 = vector.broadcast %c8_i32_10 : i32 to vector<4x96xi32>
    %37 = arith.addi %34, %36 : vector<4x96xi32>
    %38 = arith.cmpi slt, %29, %37 : vector<4x96xi32>
    %39 = arith.andi %35, %38 : vector<4x96xi1>
    %cst_11 = arith.constant 1.000000e+00 : f32
    %cst_12 = arith.constant 0.000000e+00 : f32
    %40 = vector.broadcast %cst_11 : f32 to vector<4x96xf32>
    %41 = vector.broadcast %cst_12 : f32 to vector<4x96xf32>
    %42 = arith.select %39, %40, %41 : vector<4x96xi1>, vector<4x96xf32>
    %43 = arith.mulf %16, %27 : vector<16x4xf32>
    %cst_13 = arith.constant dense<0.000000e+00> : vector<16x96xf32>
    %44 = tpu.matmul %43, %42, %cst_13 {dimension_numbers = #tpu.dot_dimension_numbers<[1], [0], [0], [1], [0, 0, 1, 1], [], []>} : vector<16x4xf32>, vector<4x96xf32>, vector<16x96xf32> -> vector<16x96xf32>
    %45 = arith.addf %30, %44 : vector<16x96xf32>
    %c8_i32_14 = arith.constant 8 : i32
    %46 = vector.broadcast %c8_i32_14 : i32 to vector<4x96xi32>
    %47 = arith.muli %28, %46 : vector<4x96xi32>
    %c32_i32 = arith.constant 32 : i32
    %48 = vector.broadcast %c32_i32 : i32 to vector<4x96xi32>
    %49 = arith.addi %47, %48 : vector<4x96xi32>
    %50 = arith.cmpi sge, %29, %49 : vector<4x96xi32>
    %c8_i32_15 = arith.constant 8 : i32
    %51 = vector.broadcast %c8_i32_15 : i32 to vector<4x96xi32>
    %52 = arith.addi %49, %51 : vector<4x96xi32>
    %53 = arith.cmpi slt, %29, %52 : vector<4x96xi32>
    %54 = arith.andi %50, %53 : vector<4x96xi1>
    %cst_16 = arith.constant 1.000000e+00 : f32
    %cst_17 = arith.constant 0.000000e+00 : f32
    %55 = vector.broadcast %cst_16 : f32 to vector<4x96xf32>
    %56 = vector.broadcast %cst_17 : f32 to vector<4x96xf32>
    %57 = arith.select %54, %55, %56 : vector<4x96xi1>, vector<4x96xf32>
    %58 = arith.mulf %18, %27 : vector<16x4xf32>
    %cst_18 = arith.constant dense<0.000000e+00> : vector<16x96xf32>
    %59 = tpu.matmul %58, %57, %cst_18 {dimension_numbers = #tpu.dot_dimension_numbers<[1], [0], [0], [1], [0, 0, 1, 1], [], []>} : vector<16x4xf32>, vector<4x96xf32>, vector<16x96xf32> -> vector<16x96xf32>
    %60 = arith.addf %45, %59 : vector<16x96xf32>
    %c8_i32_19 = arith.constant 8 : i32
    %61 = vector.broadcast %c8_i32_19 : i32 to vector<4x96xi32>
    %62 = arith.muli %28, %61 : vector<4x96xi32>
    %c64_i32 = arith.constant 64 : i32
    %63 = vector.broadcast %c64_i32 : i32 to vector<4x96xi32>
    %64 = arith.addi %62, %63 : vector<4x96xi32>
    %65 = arith.cmpi sge, %29, %64 : vector<4x96xi32>
    %c8_i32_20 = arith.constant 8 : i32
    %66 = vector.broadcast %c8_i32_20 : i32 to vector<4x96xi32>
    %67 = arith.addi %64, %66 : vector<4x96xi32>
    %68 = arith.cmpi slt, %29, %67 : vector<4x96xi32>
    %69 = arith.andi %65, %68 : vector<4x96xi1>
    %cst_21 = arith.constant 1.000000e+00 : f32
    %cst_22 = arith.constant 0.000000e+00 : f32
    %70 = vector.broadcast %cst_21 : f32 to vector<4x96xf32>
    %71 = vector.broadcast %cst_22 : f32 to vector<4x96xf32>
    %72 = arith.select %69, %70, %71 : vector<4x96xi1>, vector<4x96xf32>
    %73 = arith.mulf %20, %27 : vector<16x4xf32>
    %cst_23 = arith.constant dense<0.000000e+00> : vector<16x96xf32>
    %74 = tpu.matmul %73, %72, %cst_23 {dimension_numbers = #tpu.dot_dimension_numbers<[1], [0], [0], [1], [0, 0, 1, 1], [], []>} : vector<16x4xf32>, vector<4x96xf32>, vector<16x96xf32> -> vector<16x96xf32>
    %75 = arith.addf %60, %74 : vector<16x96xf32>
    %76 = tpu.iota {dimensions = array<i32: 0>} : vector<96x32xi32>
    %77 = tpu.iota {dimensions = array<i32: 1>} : vector<96x32xi32>
    %cst_24 = arith.constant 0.000000e+00 : f32
    %78 = vector.broadcast %cst_24 : f32 to vector<96x32xf32>
    %c0_i32_25 = arith.constant 0 : i32
    %79 = vector.broadcast %c0_i32_25 : i32 to vector<96x32xi32>
    %80 = arith.addi %77, %79 : vector<96x32xi32>
    %81 = arith.cmpi eq, %76, %80 : vector<96x32xi32>
    %cst_26 = arith.constant 1.000000e+00 : f32
    %cst_27 = arith.constant 0.000000e+00 : f32
    %82 = vector.broadcast %cst_26 : f32 to vector<96x32xf32>
    %83 = vector.broadcast %cst_27 : f32 to vector<96x32xf32>
    %84 = arith.select %81, %82, %83 : vector<96x32xi1>, vector<96x32xf32>
    %85 = arith.addf %78, %84 : vector<96x32xf32>
    %c32_i32_28 = arith.constant 32 : i32
    %86 = vector.broadcast %c32_i32_28 : i32 to vector<96x32xi32>
    %87 = arith.addi %77, %86 : vector<96x32xi32>
    %88 = arith.cmpi eq, %76, %87 : vector<96x32xi32>
    %cst_29 = arith.constant 1.000000e+00 : f32
    %cst_30 = arith.constant 0.000000e+00 : f32
    %89 = vector.broadcast %cst_29 : f32 to vector<96x32xf32>
    %90 = vector.broadcast %cst_30 : f32 to vector<96x32xf32>
    %91 = arith.select %88, %89, %90 : vector<96x32xi1>, vector<96x32xf32>
    %92 = arith.addf %85, %91 : vector<96x32xf32>
    %c64_i32_31 = arith.constant 64 : i32
    %93 = vector.broadcast %c64_i32_31 : i32 to vector<96x32xi32>
    %94 = arith.addi %77, %93 : vector<96x32xi32>
    %95 = arith.cmpi eq, %76, %94 : vector<96x32xi32>
    %cst_32 = arith.constant 1.000000e+00 : f32
    %cst_33 = arith.constant 0.000000e+00 : f32
    %96 = vector.broadcast %cst_32 : f32 to vector<96x32xf32>
    %97 = vector.broadcast %cst_33 : f32 to vector<96x32xf32>
    %98 = arith.select %95, %96, %97 : vector<96x32xi1>, vector<96x32xf32>
    %99 = arith.addf %92, %98 : vector<96x32xf32>
    %100 = arith.mulf %2, %75 : vector<16x96xf32>
    %cst_34 = arith.constant dense<0.000000e+00> : vector<16x32xf32>
    %101 = tpu.matmul %100, %99, %cst_34 {dimension_numbers = #tpu.dot_dimension_numbers<[1], [0], [0], [1], [0, 0, 1, 1], [], []>} : vector<16x96xf32>, vector<96x32xf32>, vector<16x32xf32> -> vector<16x32xf32>
    %c0_35 = arith.constant 0 : index
    %c0_36 = arith.constant 0 : index
    %102 = vector.load %arg4[%c0_35, %c0_36] : memref<16x32xf32, #tpu.memory_space<vmem>>, vector<16x32xf32>
    tpu.vector_store %arg4[%c0_35, %c0_36], %101 {strides = array<i32>} : memref<16x32xf32, #tpu.memory_space<vmem>>, vector<16x32xf32>,
    return
  }
  func.func @transform_0(%arg0: i32) -> (i32, i32) {
    %c0_i32 = arith.constant 0 : i32
    %c0_i32_0 = arith.constant 0 : i32
    return %arg0, %c0_i32 : i32, i32
  }
  func.func @transform_1(%arg0: i32) -> (i32, i32) {
    %c0_i32 = arith.constant 0 : i32
    %c0_i32_0 = arith.constant 0 : i32
    %c0_i32_1 = arith.constant 0 : i32
    return %c0_i32, %c0_i32_0 : i32, i32
  }
  func.func @transform_2(%arg0: i32) -> (i32, i32) {
    %c0_i32 = arith.constant 0 : i32
    %c0_i32_0 = arith.constant 0 : i32
    %c0_i32_1 = arith.constant 0 : i32
    return %c0_i32, %c0_i32_0 : i32, i32
  }
  func.func @transform_3(%arg0: i32) -> (i32, i32) {
    %c0_i32 = arith.constant 0 : i32
    %c0_i32_0 = arith.constant 0 : i32
    return %arg0, %c0_i32 : i32, i32
  }
}

</mosaic_0001>

<bundles_post_ra>
// kernel: tpu_custom_call.1
= control target key start
LH: loop header
LB: loop body
LE: loop exit
PB: predicated region body
PF: predicated region fallthrough
CT: control target
= control target key end

     0   :  { %vm29_vm0 = vcmask 785408   ;;  %s1374_s0 = inlined_call_operand.vmem [shape: f32[16,96], index: 0, kind: input, shape index: {}]   ;;  %s1375_s1 = inlined_call_operand.vmem [shape: f32[96,96], index: 1, kind: input, shape index: {}]   ;;  %s1376_s2 = inlined_call_operand.vmem [shape: f32[96,12], index: 2, kind: input, shape index: {}]   ;;  %s1377_s3 = inlined_call_operand.hbm [shape: f32[16,32], index: 3, kind: output, shape index: {}]  }
   0x1   :  { %v17_v0 = vld [vmem:[%s1375_s1] sm:$0xff]  ;;  %v18_v1 = vld [vmem:[%s1375_s1 + $0x8] sm:$0xff]  ;;  %v19_v2 = vld [vmem:[%s1375_s1 + $0x10] sm:$0xff] }
   0x2   :  { %v983_v3 = vpack.c.bf16 %v18_v1, %v17_v0  ;;  %v20_v4 = vld [vmem:[%s1375_s1 + $0x18] sm:$0xff]  ;;  %v21_v6 = vld [vmem:[%s1375_s1 + $0x20] sm:$0xff]  ;;  %v22_v7 = vld [vmem:[%s1375_s1 + $0x28] sm:$0xff] }
   0x3   :  { %v987_v5 = vpack.c.bf16 %v20_v4, %v19_v2  ;;  %v15_v8 = vld [vmem:[%s1374_s0] sm:$0xff]  ;;  %v991_v10 = vpack.c.bf16 %v22_v7, %v21_v6  ;;  %v112_v11 = vld [vmem:[%s1376_s2 + $0x8] sm:$0xff]  ;;  %v113_v12 = vld [vmem:[%s1376_s2 + $0x10] sm:$0xff] }
   0x4   :  { %984 = vmatprep.subr.bf16.mxu0 %v983_v3  ;;  %v111_v9 = vld [vmem:[%s1376_s2] sm:$0xff]  ;;  %911 = vmatprep.mubr.msk.f32.mxu0 %vm29_vm0, %v15_v8  ;;  %v114_v13 = vld [vmem:[%s1376_s2 + $0x18] sm:$0xff]  ;;  %v23_v14 = vld [vmem:[%s1375_s1 + $0x30] sm:$0xff] }
   0x5   :  { %986 = vmatpush3.bf16.msra.mxu0 %v983_v3  ;;  %v24_v15 = vld [vmem:[%s1375_s1 + $0x38] sm:$0xff]  ;;  %v1007_v16 = vpack.c.bf16 %v112_v11, %v111_v9  ;;  %v1011_v17 = vpack.c.bf16 %v114_v13, %v113_v12  ;;  %v115_v18 = vld [vmem:[%s1376_s2 + $0x20] sm:$0xff]  ;;  %v116_v19 = vld [vmem:[%s1376_s2 + $0x28] sm:$0xff] }
   0x6   :  { %988 = vmatprep.subr.bf16.mxu0 %v987_v5 }
   0x7   :  { %1008 = vmatprep.subr.bf16.mxu1 %v1007_v16 }
   0x9   :  { %990 = vmatpush3.bf16.msra.mxu0 %v987_v5 }
   0xa   :  { %8 = vsyncpa [#allocation3], 0  ;;  %992 = vmatprep.subr.bf16.mxu0 %v991_v10  ;;  %v995_v20 = vpack.c.bf16 %v24_v15, %v23_v14  ;;  %1010 = vmatpush3.bf16.msra.mxu1 %v1007_v16  ;;  %v25_v21 = vld [vmem:[%s1375_s1 + $0x40] sm:$0xff]  ;;  %v26_v22 = vld [vmem:[%s1375_s1 + $0x48] sm:$0xff]  ;;  %v1015_v23 = vpack.c.bf16 %v116_v19, %v115_v18  ;;  %s1109_s9 = smov 4   ;;  %s1110_s10 = smov 8  }
   0xb   :  { %1012 = vmatprep.subr.bf16.mxu1 %v1011_v17  ;;  %v117_v24 = vld [vmem:[%s1376_s2 + $0x30] sm:$0xff]  ;;  %v118_v25 = vld [vmem:[%s1376_s2 + $0x38] sm:$0xff]  ;;  %v999_v26 = vpack.c.bf16 %v26_v22, %v25_v21  ;;  %v119_v30 = vld [vmem:[%s1376_s2 + $0x40] sm:$0xff]  ;;  %vm327_vm5 = vcmask 1043456   ;;  %s1113_s11 = smov [#allocation2]  }
   0xc   :  { %v27_v27 = vld [vmem:[%s1375_s1 + $0x50] sm:$0xff]  ;;  %v28_v28 = vld [vmem:[%s1375_s1 + $0x58] sm:$0xff]  ;;  %v1019_v29 = vpack.c.bf16 %v118_v25, %v117_v24  ;;  %v120_v31 = vld [vmem:[%s1376_s2 + $0x48] sm:$0xff]  ;;  %v288_v24 = vlaneseq  ;;  %s806_s12 = sshll.u32 %s1113_s11, 4  ;;  %s807_s12 = int_to_ptr.vmem [resolvable:$true] %s806_s12 }
   0xd   :  { %994 = vmatpush3.bf16.msra.mxu0 %v991_v10  ;;  %v1003_v32 = vpack.c.bf16 %v28_v28, %v27_v27  ;;  %v1023_v33 = vpack.c.bf16 %v120_v31, %v119_v30  ;;  %v121_v34 = vld [vmem:[%s1376_s2 + $0x50] sm:$0xff]  ;;  %v122_v35 = vld [vmem:[%s1376_s2 + $0x58] sm:$0xff]  ;;  %v16_v37 = vld [vmem:[%s1374_s0 + $0x8] sm:$0xff]  ;;  %s1107_s0 = smov 120   ;;  %s1108_s2 = smov 124  }
   0xe   :  { %996 = vmatprep.subr.bf16.mxu0 %v995_v20  ;;  %1014 = vmatpush3.bf16.msra.mxu1 %v1011_v17  ;;  %v1027_v36 = vpack.c.bf16 %v122_v35, %v121_v34  ;;  %v1241_v27 = vshrl.u32 %v288_v24, 7  ;;  %s1083_s13 = scalar_lea.vmem %s807_s12, 256  ;;  %p1088_p1 = scmp.lt.s32.totalorder %s807_s12, %s807_s12 }
   0xf   :  { %1016 = vmatprep.subr.bf16.mxu1 %v1015_v23  ;;  %p1084_p0 = scmp.ne.s32.totalorder %s807_s12, %s1083_s13  ;;  %p1089_p2 = scmp.lt.s32.totalorder %s1083_s13, %s1083_s13 }
  0x10   :  { %v1247_v30 = vmul.u32 8, %v1241_v27 }
  0x11   :  { %998 = vmatpush3.bf16.msra.mxu0 %v995_v20  ;;  %p1090_p3 = por %p1089_p2, %p1088_p1 }
  0x12   :  { %1000 = vmatprep.subr.bf16.mxu0 %v999_v26  ;;  %1018 = vmatpush3.bf16.msra.mxu1 %v1015_v23 }
  0x13   :  { %1020 = vmatprep.subr.bf16.mxu1 %v1019_v29  ;;  %p1091_p4 = pnand %p1090_p3, %p1084_p0 }
  0x15   :  { %1002 = vmatpush3.bf16.msra.mxu0 %v999_v26 }
  0x16   :  { %1004 = vmatprep.subr.bf16.mxu0 %v1003_v32  ;;  %1022 = vmatpush3.bf16.msra.mxu1 %v1019_v29  ;;  %v1244_v29 = vand.u32 127, %v288_v24  ;;  %v490_v24 = vadd.s32 64, %v1247_v30 }
  0x17   :  { %1024 = vmatprep.subr.bf16.mxu1 %v1023_v33 }
  0x18   :  { %vm293_vm7 = vcmp.ge.s32.totalorder %v1244_v29, %v1247_v30  ;;  %vm605_vm10 = vcmp.eq.s32.totalorder %v1241_v27, %v1244_v29 }
  0x19   :  { %1006 = vmatpush3.bf16.msra.mxu0 %v1003_v32 }
  0x1a   :  { %1026 = vmatpush3.bf16.msra.mxu1 %v1023_v33  ;;  %v300_v33 = vadd.s32 32, %v1247_v30 }
  0x1b   :  { %1028 = vmatprep.subr.bf16.mxu1 %v1027_v36 }
  0x1c   :  { %912 = vmatmul.mubr.msk.f32.vlgmr.msra.gmra.mrb[0].mxu0 %vm29_vm0, %v16_v37  ;;  %vm301_vm3 = vcmp.ge.s32.totalorder %v1244_v29, %v300_v33  ;;  %v302_v35 = vadd.s32 8, %v300_v33 }
  0x1e   :  { %1030 = vmatpush3.bf16.msra.mxu1 %v1027_v36  ;;  %vm303_vm4 = vcmp.lt.s32.totalorder %v1244_v29, %v302_v35  ;;  %v1111_v36 = vmov 0.0   ;;  %v603_v35 = vadd.s32 80, %v1241_v27 }
  0x1f   :  { %vm304_vm6 = vmand %vm301_vm3, %vm303_vm4 }
  0x20   :  { %v305_v37 = vsel %vm304_vm6, 1.0, %v1111_v36 }
  0x21   :  { %941 = vmatprep.subr.msk.mxu0 %vm327_vm5, %v305_v37 }
  0x22   :  { %942 = vmatpush3.msk.msra.mxu0 %vm327_vm5, %v305_v37  ;;  %v604_v37 = vadd.s32 88, %v1241_v27 }
  0xef   :  { %v1215_v38 = vpop.f32.mrb[0].mxu0 }
  0xf0   :  { %v1217_v39 = vpop.f32.mrb[1].mxu0 }
  0xf1   :  { %938 = vmatprep.mubr.msk.f32.mxu1 %vm29_vm0, %v1217_v39 }
  0xf2   :  { %939 = vmatmul.mubr.msk.f32.vlgmr.msra.gmra.mrb[0].mxu1 %vm29_vm0, %v1215_v38 }
 0x1c5   :  { %v940_v40 = vpop.f32.mrb[0].mxu1 }
 0x1c6   :  { %v195_v41 = vpop.f32.mrb[1].mxu1  ;;  %v207_v43 = vmul.f32 0.2, %v940_v40  ;;  %vm205_vm2 = vcmp.gt.f32.partialorder %v940_v40, 0.0 }
 0x1c7   :  { %vm204_vm1 = vcmp.gt.f32.partialorder %v195_v41, 0.0  ;;  %v206_v42 = vmul.f32 0.2, %v195_v41 }
 0x1c8   :  { %v209_v45 = vsel %vm205_vm2, %v940_v40, %v207_v43  ;;  %v294_v40 = vadd.s32 8, %v1247_v30 }
 0x1c9   :  { %v208_v44 = vsel %vm204_vm1, %v195_v41, %v206_v42 }
 0x1ca   :  { %220 = vrot.lane.b32.xlu1 %v208_v44, %s1107_s0  ;;  %212 = vrot.lane.b32.xlu0 %v208_v44, %s1108_s2  ;;  %vm295_vm8 = vcmp.lt.s32.totalorder %v1244_v29, %v294_v40 }
 0x1cb   :  { %vm296_vm9 = vmand %vm293_vm7, %vm295_vm8 }
 0x1cc   :  { %v1267_v41 = vsel %vm296_vm9, 1.0, %v1111_v36 }
 0x1cd   :  { %946 = vmatprep.subr.msk.mxu0 %vm327_vm5, %v1267_v41 }
 0x1ce   :  { %222 = vrot.lane.b32.xlu1 %v209_v45, %s1107_s0  ;;  %214 = vrot.lane.b32.xlu0 %v209_v45, %s1108_s2 }
 0x23c   :  { %v221_v46 = vpop.permute.xlu1 %220  ;;  %v213_v47 = vpop.permute.xlu0 %212 }
 0x23d   :  { %v218_v48 = vmax.f32 %v208_v44, %v213_v47 }
 0x23f   :  { %v226_v49 = vmax.f32 %v218_v48, %v221_v46 }
 0x240   :  { %v215_v50 = vpop.permute.xlu0 %214  ;;  %v223_v52 = vpop.permute.xlu1 %222 }
 0x241   :  { %v219_v51 = vmax.f32 %v209_v45, %v215_v50  ;;  %236 = vrot.lane.b32.xlu0 %v226_v49, %s1109_s9  ;;  %v228_v6 = vsub.f32 %v208_v44, %v226_v49  ;;  %v594_v50 = vadd.s32 8, %v1241_v27 }
 0x243   :  { %v227_v53 = vmax.f32 %v219_v51, %v223_v52  ;;  %v230_v8 = vmul.f32 1.442695, %v228_v6  ;;  %v595_v51 = vadd.s32 16, %v1241_v27  ;;  %v596_v52 = vadd.s32 24, %v1241_v27 }
 0x244   :  { %vm606_vm11 = vcmp.eq.s32.totalorder %v594_v50, %v1244_v29  ;;  %v602_v6 = vadd.s32 72, %v1241_v27 }
 0x245   :  { %248 = vrot.lane.b32.xlu0 %v226_v49, %s1110_s10  ;;  %238 = vrot.lane.b32.xlu1 %v227_v53, %s1109_s9  ;;  %v229_v7 = vsub.f32 %v209_v45, %v227_v53  ;;  %vm607_vm12 = vcmp.eq.s32.totalorder %v595_v51, %v1244_v29  ;;  %vm1031_vm13 = vmpackc.low %vm606_vm11, %vm605_vm10  ;;  %vm608_vm14 = vcmp.eq.s32.totalorder %v596_v52, %v1244_v29 }
 0x246   :  { %vm1295_vm3 = vmpackc.low %vm608_vm14, %vm607_vm12  ;;  %vm614_vm11 = vcmp.eq.s32.totalorder %v602_v6, %v1244_v29 }
 0x247   :  { %v232_v9 = vmul.f32 1.442695, %v229_v7 }
 0x249   :  { %250 = vrot.lane.b32.xlu1 %v227_v53, %s1110_s10  ;;  %v597_v53 = vadd.s32 32, %v1241_v27 }
 0x24b   :  { %vm609_vm15 = vcmp.eq.s32.totalorder %v597_v53, %v1244_v29 }
 0x2b3   :  { %v237_v54 = vpop.permute.xlu0 %236 }
 0x2b4   :  { %v242_v55 = vsub.f32 %v208_v44, %v237_v54  ;;  %v598_v54 = vadd.s32 40, %v1241_v27 }
 0x2b6   :  { %v244_v56 = vmul.f32 1.442695, %v242_v55  ;;  %v1285_v55 = vadd.s32 32, %v1244_v29  ;;  %vm610_vm1 = vcmp.eq.s32.totalorder %v598_v54, %v1244_v29 }
 0x2b7   :  { %v239_v57 = vpop.permute.xlu1 %238  ;;  %v249_v58 = vpop.permute.xlu0 %248 }
 0x2b8   :  { %1067 = vpow2.f32 %v244_v56  ;;  %v243_v59 = vsub.f32 %v209_v45, %v239_v57  ;;  %v254_v60 = vsub.f32 %v208_v44, %v249_v58  ;;  %v599_v56 = vadd.s32 48, %v1241_v27 }
 0x2b9   :  { %v600_v57 = vadd.s32 56, %v1241_v27  ;;  %vm646_vm2 = vcmp.eq.s32.totalorder %v597_v53, %v1285_v55  ;;  %v1112_v58 = vmov 1.0|1.0   ;;  %vm647_vm4 = vcmp.eq.s32.totalorder %v598_v54, %v1285_v55 }
 0x2ba   :  { %v246_v61 = vmul.f32 1.442695, %v243_v59  ;;  %v256_v62 = vmul.f32 1.442695, %v254_v60  ;;  %1032 = vmatprep.subr.msk.bf16.mxu1 %vm1031_vm13, %v1112_v58  ;;  %v621_v60 = vsel %vm609_vm15, 1.0, %v1111_v36  ;;  %vm611_vm6 = vcmp.eq.s32.totalorder %v599_v56, %v1244_v29 }
 0x2bb   :  { %v251_v63 = vpop.permute.xlu1 %250  ;;  %1034 = vmatpush3.bf16.msk.msra.mxu1 %vm1031_vm13, %v1112_v58  ;;  %vm612_vm7 = vcmp.eq.s32.totalorder %v600_v57, %v1244_v29  ;;  %vm648_vm8 = vcmp.eq.s32.totalorder %v599_v56, %v1285_v55  ;;  %vm649_vm9 = vcmp.eq.s32.totalorder %v600_v57, %v1285_v55  ;;  %vm651_vm13 = vcmp.eq.s32.totalorder %v602_v6, %v1285_v55 }
 0x2bc   :  { %1069 = vpow2.f32 %v246_v61  ;;  %v255_v0 = vsub.f32 %v209_v45, %v251_v63  ;;  %v622_v61 = vsel %vm610_vm1, 1.0, %v1111_v36  ;;  %v659_v63 = vsel %vm647_vm4, 1.0, %v1111_v36  ;;  %1036 = vmatprep.subr.msk.bf16.mxu1 %vm1295_vm3, %v1112_v58 }
 0x2bd   :  { %1071 = vpow2.f32 %v256_v62  ;;  %v658_v62 = vsel %vm646_vm2, 1.0, %v1111_v36  ;;  %vm491_vm1 = vcmp.ge.s32.totalorder %v1244_v29, %v490_v24 }
 0x2be   :  { %v258_v1 = vmul.f32 1.442695, %v255_v0  ;;  %v670_v0 = vadd.f32 %v658_v62, %v621_v60 }
 0x2bf   :  { %1038 = vmatpush3.bf16.msk.msra.mxu1 %vm1295_vm3, %v1112_v58  ;;  %vm322_vm3 = vcmask 31744  }
 0x2c0   :  { %1073 = vpow2.f32 %v258_v1  ;;  %v671_v1 = vadd.f32 %v659_v63, %v622_v61 }
 0x2c1   :  { %1075 = vpow2.f32 %v230_v8  ;;  %v661_v8 = vsel %vm649_vm9, 1.0, %v1111_v36  ;;  %vm653_vm9 = vcmp.eq.s32.totalorder %v604_v37, %v1285_v55 }
 0x2c2   :  { %v1068_v2 = vpop.eup %1067  ;;  %1077 = vpow2.f32 %v232_v9  ;;  %v1039_v7 = vpack.c.bf16 %v671_v1, %v670_v0 }
 0x2c3   :  { %262 = vrot.lane.b32.xlu0 %v1068_v2, %s1108_s2 }
 0x2c4   :  { %1040 = vmatprep.subr.bf16.mxu1 %v1039_v7 }
 0x2c5   :  { %1042 = vmatpush3.bf16.msra.mxu1 %v1039_v7 }
 0x2c6   :  { %v1070_v3 = vpop.eup %1069 }
 0x2c7   :  { %v1232_v4 = vpop.eup %1071  ;;  %264 = vrot.lane.b32.xlu1 %v1070_v3, %s1108_s2 }
 0x2c8   :  { %272 = vrot.lane.b32.xlu0 %v1232_v4, %s1107_s0 }
 0x2ca   :  { %v1237_v5 = vpop.eup %1073 }
 0x2cb   :  { %274 = vrot.lane.b32.xlu1 %v1237_v5, %s1107_s0  ;;  %v1076_v11 = vpop.eup %1075 }
 0x2cc   :  { %v1078_v15 = vpop.eup %1077 }
 0x335   :  { %v263_v10 = vpop.permute.xlu0 %262 }
 0x336   :  { %v268_v12 = vadd.f32 %v1076_v11, %v263_v10  ;;  %v1317_v10 = vadd.s32 64, %v1244_v29 }
 0x338   :  { %vm688_vm15 = vcmp.eq.s32.totalorder %v602_v6, %v1317_v10 }
 0x339   :  { %v265_v13 = vpop.permute.xlu1 %264 }
 0x33a   :  { %v273_v14 = vpop.permute.xlu0 %272  ;;  %v269_v17 = vadd.f32 %v1078_v15, %v265_v13  ;;  %v626_v13 = vsel %vm614_vm11, 1.0, %v1111_v36  ;;  %vm798_vm11 = vcmask 261120  }
 0x33b   :  { %v278_v16 = vadd.f32 %v273_v14, %v268_v12 }
 0x33d   :  { %1079 = vrcp.f32 %v278_v16  ;;  %v275_v18 = vpop.permute.xlu1 %274 }
 0x33e   :  { %v279_v19 = vadd.f32 %v275_v18, %v269_v17 }
 0x340   :  { %1081 = vrcp.f32 %v279_v19 }
 0x347   :  { %v1080_v20 = vpop.eup %1079 }
 0x348   :  { %v282_v21 = vmul.f32 %v1080_v20, %v278_v16  ;;  %v663_v16 = vsel %vm651_vm13, 1.0, %v1111_v36 }
 0x349   :  { %v675_v18 = vadd.f32 %v663_v16, %v626_v13 }
 0x34a   :  { %v1082_v22 = vpop.eup %1081  ;;  %v284_v23 = vsub.f32 2.0, %v282_v21 }
 0x34b   :  { %v283_v25 = vmul.f32 %v1082_v22, %v279_v19 }
 0x34c   :  { %v286_v26 = vmul.f32 %v1080_v20, %v284_v23  ;;  %v700_v20 = vsel %vm688_vm15, 1.0, %v1111_v36 }
 0x34d   :  { %v285_v28 = vsub.f32 2.0, %v283_v25  ;;  %v492_v25 = vadd.s32 8, %v490_v24 }
 0x34e   :  { %308 = vrot.lane.b32.xlu0 %v286_v26, %s1109_s9  ;;  %v1249_v31 = vmul.f32 %v1076_v11, %v286_v26 }
 0x34f   :  { %v287_v32 = vmul.f32 %v1082_v22, %v285_v28  ;;  %v712_v22 = vadd.f32 %v700_v20, %v675_v18  ;;  %vm493_vm2 = vcmp.lt.s32.totalorder %v1244_v29, %v492_v25 }
 0x350   :  { %vm494_vm4 = vmand %vm491_vm1, %vm493_vm2 }
 0x351   :  { %310 = vrot.lane.b32.xlu1 %v287_v32, %s1109_s9  ;;  %v1253_v34 = vmul.f32 %v1078_v15, %v287_v32 }
 0x352   :  { %496 = vrot.lane.b32.xlu0 %v286_v26, %s1110_s10 }
 0x355   :  { %498 = vrot.lane.b32.xlu1 %v287_v32, %s1110_s10  ;;  %v495_v32 = vsel %vm494_vm4, 1.0, %v1111_v36 }
 0x3c0   :  { %v309_v42 = vpop.permute.xlu0 %308 }
 0x3c1   :  { %v314_v43 = vmul.f32 %v1068_v2, %v309_v42  ;;  %v623_v2 = vsel %vm611_vm6, 1.0, %v1111_v36  ;;  %vm615_vm6 = vcmp.eq.s32.totalorder %v603_v35, %v1244_v29 }
 0x3c3   :  { %318 = vrot.lane.b32.xlu0 %v314_v43, %s1108_s2  ;;  %v311_v44 = vpop.permute.xlu1 %310 }
 0x3c4   :  { %v315_v45 = vmul.f32 %v1070_v3, %v311_v44  ;;  %v497_v46 = vpop.permute.xlu0 %496  ;;  %v624_v3 = vsel %vm612_vm7, 1.0, %v1111_v36  ;;  %vm616_vm7 = vcmp.eq.s32.totalorder %v604_v37, %v1244_v29 }
 0x3c5   :  { %v502_v47 = vmul.f32 %v1232_v4, %v497_v46  ;;  %v660_v4 = vsel %vm648_vm8, 1.0, %v1111_v36  ;;  %v673_v11 = vadd.f32 %v661_v8, %v624_v3  ;;  %vm652_vm8 = vcmp.eq.s32.totalorder %v603_v35, %v1285_v55 }
 0x3c6   :  { %320 = vrot.lane.b32.xlu1 %v315_v45, %s1108_s2  ;;  %v672_v9 = vadd.f32 %v660_v4, %v623_v2  ;;  %v664_v40 = vsel %vm652_vm8, 1.0, %v1111_v36 }
 0x3c7   :  { %506 = vrot.lane.b32.xlu0 %v502_v47, %s1107_s0  ;;  %v499_v48 = vpop.permute.xlu1 %498 }
 0x3c8   :  { %v503_v49 = vmul.f32 %v1237_v5, %v499_v48  ;;  %v601_v5 = vadd.s32 64, %v1241_v27  ;;  %v1043_v15 = vpack.c.bf16 %v673_v11, %v672_v9 }
 0x3ca   :  { %508 = vrot.lane.b32.xlu1 %v503_v49, %s1107_s0  ;;  %vm613_vm10 = vcmp.eq.s32.totalorder %v601_v5, %v1244_v29  ;;  %vm650_vm12 = vcmp.eq.s32.totalorder %v601_v5, %v1285_v55  ;;  %vm687_vm14 = vcmp.eq.s32.totalorder %v601_v5, %v1317_v10  ;;  %1044 = vmatprep.subr.bf16.mxu1 %v1043_v15 }
 0x3cb   :  { %v625_v12 = vsel %vm613_vm10, 1.0, %v1111_v36  ;;  %v662_v14 = vsel %vm650_vm12, 1.0, %v1111_v36  ;;  %v699_v19 = vsel %vm687_vm14, 1.0, %v1111_v36  ;;  %1046 = vmatpush3.bf16.msra.mxu1 %v1043_v15  ;;  %vm690_vm10 = vcmp.eq.s32.totalorder %v604_v37, %v1317_v10 }
 0x3cc   :  { %v674_v17 = vadd.f32 %v662_v14, %v625_v12  ;;  %v702_v29 = vsel %vm690_vm10, 1.0, %v1111_v36 }
 0x3ce   :  { %v711_v21 = vadd.f32 %v699_v19, %v674_v17 }
 0x3d0   :  { %v1047_v23 = vpack.c.bf16 %v712_v22, %v711_v21 }
 0x3d2   :  { %1048 = vmatprep.subr.bf16.mxu1 %v1047_v23 }
 0x3d3   :  { %1050 = vmatpush3.bf16.msra.mxu1 %v1047_v23 }
 0x435   :  { %v319_v26 = vpop.permute.xlu0 %318 }
 0x436   :  { %943 = vmatprep.mubr.msk.f32.mxu0 %vm322_vm3, %v319_v26 }
 0x438   :  { %v321_v28 = vpop.permute.xlu1 %320 }
 0x439   :  { %944 = vmatmul.mubr.msk.f32.vlgmr.msra.gmra.mrb[2].mxu0 %vm322_vm3, %v321_v28  ;;  %v507_v30 = vpop.permute.xlu0 %506 }
 0x43a   :  { %947 = vmatpush3.msk.msra.mxu0 %vm327_vm5, %v1267_v41  ;;  %948 = vmatprep.mubr.msk.f32.mxu0 %vm322_vm3, %v1249_v31  ;;  %v627_v31 = vsel %vm615_vm6, 1.0, %v1111_v36  ;;  %v665_v41 = vsel %vm653_vm9, 1.0, %v1111_v36 }
 0x43b   :  { %951 = vmatprep.subr.msk.mxu0 %vm327_vm5, %v495_v32  ;;  %v676_v42 = vadd.f32 %v664_v40, %v627_v31 }
 0x43c   :  { %v509_v33 = vpop.permute.xlu1 %508 }
 0x441   :  { %949 = vmatmul.mubr.msk.f32.vlgmr.msra.gmra.mrb[2].mxu0 %vm322_vm3, %v1253_v34  ;;  %v628_v34 = vsel %vm616_vm7, 1.0, %v1111_v36 }
 0x442   :  { %952 = vmatpush3.msk.msra.mxu0 %vm327_vm5, %v495_v32  ;;  %953 = vmatprep.mubr.msk.f32.mxu0 %vm322_vm3, %v507_v30  ;;  %v677_v43 = vadd.f32 %v665_v41, %v628_v34  ;;  %vm689_vm5 = vcmp.eq.s32.totalorder %v603_v35, %v1317_v10 }
 0x443   :  { %v701_v27 = vsel %vm689_vm5, 1.0, %v1111_v36 }
 0x444   :  { %v713_v44 = vadd.f32 %v701_v27, %v676_v42  ;;  %v714_v45 = vadd.f32 %v702_v29, %v677_v43 }
 0x446   :  { %v1051_v46 = vpack.c.bf16 %v714_v45, %v713_v44 }
 0x448   :  { %1052 = vmatprep.subr.bf16.mxu1 %v1051_v46 }
 0x449   :  { %954 = vmatmul.mubr.msk.f32.vlgmr.msra.gmra.mrb[2].mxu0 %vm322_vm3, %v509_v33  ;;  %1054 = vmatpush3.bf16.msra.mxu1 %v1051_v46 }
 0x51c   :  { %v955_v47 = vpop.f32.mrb[2].mxu0 }
 0x51d   :  { %v716_v48 = vmul.f32 %v955_v47, %v1215_v38  ;;  %v583_v49 = vpop.f32.mrb[3].mxu0 }
 0x51e   :  { %v715_v50 = vmul.f32 %v583_v49, %v1217_v39 }
 0x520   :  { %980 = vmatprep.mubr.msk.f32.mxu1 %vm29_vm0, %v715_v50 }
 0x521   :  { %981 = vmatmul.mubr.msk.f32.vlgmr.msra.gmra.mrb[2].mxu1 %vm29_vm0, %v716_v48 }
 0x5f4   :  { %v982_v51 = vpop.f32.mrb[2].mxu1 }
 0x5f5   :  { %800 = vst.msk [vmem:[#allocation2 + $0x8] sm:$0xff] %vm798_vm11, %v982_v51  ;;  %v789_v36 = vpop.f32.mrb[3].mxu1 }
 0x5f6   :  { %799 = vst.msk [vmem:[#allocation2] sm:$0xff] %vm798_vm11, %v789_v36 }
 0x5f7   :  { %1094 = shalt.err (!%p1091_p4)
}
 0x5f8   :  { %s1095_s16 = scalar_lea.hbm %s1377_s3, 256 }
 0x5f9   :  { %p1096_p5 = scmp.ne.s32.totalorder %s1377_s3, %s1095_s16  ;;  %p1099_p6 = scmp.lt.u32.totalorder %s1095_s16, %s1377_s3 }
 0x5fb   :  { %p1101_p7 = pnand %p1099_p6, %p1096_p5 }
 0x5fd   :  { %1104 = shalt.err (!%p1101_p7)
}
 0x5fe   :  { %s1114_s21 = smov 128  }
 0x5ff   :  { %812 = dma.vmem_to_hbm [thread:$0]  %s807_s12, 256, %s1377_s3, [#allocation3], %s1114_s21, %s1114_s21, %s1110_s10  }
 0x600   :  { %1105 = dma.done.wait [#allocation3], 256  }
 0x601   :  { %1106 = vsyncadd [#allocation3], 4294967040 }
 0x602   :  { %816 = vsyncpa [#allocation3], 1 }

</bundles_post_ra>
